<compile_context>
chip_gen: v6e
topology: v6e:2x2x1
jax: 0.10.0
libtpu: 0.0.40
codegen_flags: <defaults>
</compile_context>

<pallas_src>
import jax
import jax.numpy as jnp
from jax.experimental import pallas as pl
from jax.experimental.pallas import tpu as pltpu

OT_INDEX = 6  # 'OT' is index 6 of base_feature_cols


def _round_up(a, m):
    return (a + m - 1) // m * m


def _dlinear_kernel(x_ref, w_ref, b_ref, out_ref):
    """One batch tile: (TB, L) @ (L, P) + (1, P) -> (TB, P), f32 accumulation."""
    out_ref[...] = (
        jnp.dot(x_ref[...], w_ref[...], preferred_element_type=jnp.float32)
        + b_ref[...]
    ).astype(out_ref.dtype)


def _choose_batch_tile(B, L, P, itemsize, block_b):
    """Pick TB: multiple of 8, >= 4 grid steps when possible, fits VMEM budget."""
    # Per-call VMEM use: double-buffered x/out tiles + double-buffered (grid-
    # invariant) weight/bias copies that Pallas allocates by default.
    def usage(tb):
        return (2 * (tb * L * itemsize + tb * P * 4)
                + 2 * (L * P * itemsize + P * 4))

    budget = 40 << 20            # conservative: leaves headroom inside v7x's 64 MiB/TC
    min_steps = 4                # >= 2 TensorCores (v7x) x 2 steps for pipelining
    tb = max(8, min(_round_up(block_b, 8), _round_up(pl.cdiv(B, min_steps), 8)))
    tb = min(tb, _round_up(B, 8))
    while tb > 8 and usage(tb) > budget:
        tb = max(8, _round_up(tb // 2, 8))
    return tb, usage(tb)


def dlinear_leakproof_forward(x, params, *, kernel_size, block_b=2048, use_bf16=True):
    """Forward pass of DLinear_Leakproof (eval mode).

    x       : (B, L, F) float32
    params  : dict with w_seasonal/b_seasonal/w_trend/b_trend (nn.Linear layout (P, L), (P,))
    returns : (B, P) float32
    """
    B, L, _ = x.shape
    P = params["w_seasonal"].shape[0]
    half = (kernel_size - 1) // 2
    del half  # encoded in the clipped-position matrix below

    # --- OT channel select: plain XLA slice (no in-kernel strided gather). ---
    x_ot = x[:, :, OT_INDEX].astype(jnp.float32)                       # (B, L)

    # --- Fold the edge-replicated moving average into an (L, L) matrix A. ---
    # trend[b, i] = (1/k) * sum_j x_ot[b, clip(i + j - (k-1)//2, 0, L-1)]
    pos = jnp.arange(L)[:, None] + jnp.arange(kernel_size)[None, :] - (kernel_size - 1) // 2
    pos = jnp.clip(pos, 0, L - 1)                                      # (L, k)
    rows = jnp.broadcast_to(jnp.arange(L)[:, None], pos.shape)
    A = jnp.zeros((L, L), jnp.float32).at[rows, pos].add(1.0 / kernel_size)

    # --- Combined weight / bias (one matmul instead of decomposition + two). ---
    # NOTE: bf16 cast of the folded weight embeds the Ws/Wt cancellation; fine for
    # inference at the checked tolerance, documented per review.
    ws_t = params["w_seasonal"].T.astype(jnp.float32)                  # (L, P)
    wd_t = (params["w_trend"] - params["w_seasonal"]).T.astype(jnp.float32)
    w_comb = ws_t + A.T @ wd_t                                         # (L, P)
    b_comb = (params["b_seasonal"] + params["b_trend"]).astype(jnp.float32).reshape(1, P)

    in_dtype = jnp.bfloat16 if use_bf16 else jnp.float32
    itemsize = jnp.dtype(in_dtype).itemsize
    x_in = x_ot.astype(in_dtype)                                       # (B, L), no batch pad
    w_in = w_comb.astype(in_dtype)                                     # (L, P), no lane pad

    TB, vmem_usage = _choose_batch_tile(B, L, P, itemsize, block_b)
    grid = (pl.cdiv(B, TB),)   # ragged last block handled by Pallas (OOB rows dropped)

    vmem_limit = min(vmem_usage + (16 << 20), 56 << 20)

    out = pl.pallas_call(
        _dlinear_kernel,
        out_shape=jax.ShapeDtypeStruct((B, P), jnp.float32),
        grid_spec=pltpu.PrefetchScalarGridSpec(
            num_scalar_prefetch=0,
            grid=grid,
            in_specs=[
                pl.BlockSpec((TB, L), lambda i: (i, 0)),   # activations, batch-tiled
                pl.BlockSpec((L, P), lambda i: (0, 0)),    # folded weight, VMEM-resident
                pl.BlockSpec((1, P), lambda i: (0, 0)),    # folded bias, VMEM-resident (f32)
            ],
            out_specs=pl.BlockSpec((TB, P), lambda i: (i, 0)),
        ),
        compiler_params=pltpu.CompilerParams(
            dimension_semantics=("parallel",),
            vmem_limit_bytes=vmem_limit,
        ),
    )(x_in, w_in, b_comb)

    return out


def _reference(x, params, *, kernel_size):
    """Pure-JAX reference mirroring the PyTorch forward (eval mode, un-folded math)."""
    half = (kernel_size - 1) // 2
    x_ot = x[:, :, OT_INDEX]
    front = jnp.repeat(x_ot[:, :1], half, axis=1)
    end = jnp.repeat(x_ot[:, -1:], half, axis=1)
    xp = jnp.concatenate([front, x_ot, end], axis=1)
    L = x_ot.shape[1]
    trend = jnp.mean(
        jnp.stack([xp[:, j:j + L] for j in range(kernel_size)], axis=0), axis=0)
    seasonal = x_ot - trend
    out = seasonal @ params["w_seasonal"].T + params["b_seasonal"]
    out = out + trend @ params["w_trend"].T + params["b_trend"]
    return out


if __name__ == "__main__":
    # Small, module-consistent shapes: (batch, input_len, n_features), pred_len.
    # B=20 with block_b=8 exercises a multi-block grid AND a ragged last block (20 % 8 != 0).
    B, L, F, P = 20, 32, 16, 16
    kernel_size = 5                    # odd, as required by the MovingAvg decomposition

    key = jax.random.PRNGKey(0)
    kx, kws, kbs, kwt, kbt = jax.random.split(key, 5)

    x = jax.random.normal(kx, (B, L, F), dtype=jnp.float32)

    # Deterministic parameter init (uniform ~ nn.Linear's default range 1/sqrt(in)).
    bound = 1.0 / (L ** 0.5)
    params = {
        "w_seasonal": jax.random.uniform(kws, (P, L), jnp.float32, -bound, bound),
        "b_seasonal": jax.random.uniform(kbs, (P,), jnp.float32, -bound, bound),
        "w_trend":    jax.random.uniform(kwt, (P, L), jnp.float32, -bound, bound),
        "b_trend":    jax.random.uniform(kbt, (P,), jnp.float32, -bound, bound),
    }

    ref = _reference(x, params, kernel_size=kernel_size)

    # f32 path (strict tolerance), small batch tile -> 3-step grid + ragged last block.
    out_f32 = dlinear_leakproof_forward(x, params, kernel_size=kernel_size,
                                        block_b=8, use_bf16=False)
    out_f32 = jax.block_until_ready(out_f32)
    assert out_f32.shape == (B, P)
    assert jnp.allclose(out_f32, ref, atol=1e-4, rtol=1e-4), \
        "Pallas kernel (f32) mismatch vs reference"

    # Default path: bf16 MXU inputs (valid on v5e/v6e/v7x), f32 accumulation.
    out_bf16 = dlinear_leakproof_forward(x, params, kernel_size=kernel_size, block_b=8)
    out_bf16 = jax.block_until_ready(out_bf16)
    assert out_bf16.shape == (B, P)
    assert jnp.allclose(out_bf16, ref, atol=5e-2, rtol=5e-2), \
        "Pallas kernel (bf16) mismatch vs reference"

    print("KERNEL_OK")
</pallas_src>

<mosaic_0001>
module attributes {stable_mosaic.version = 11 : i64} {
  func.func @_dlinear_kernel(%arg0: i32, %arg1: memref<8x32xf32, #tpu.memory_space<vmem>>, %arg2: memref<32x16xf32, #tpu.memory_space<vmem>>, %arg3: memref<1x16xf32, #tpu.memory_space<vmem>>, %arg4: memref<8x16xf32, #tpu.memory_space<vmem>>) attributes {dimension_semantics = [#tpu.dimension_semantics<parallel>], iteration_bounds = array<i64: 3>, scalar_prefetch = 0 : i64, scratch_operands = 0 : i64, tpu.core_type = #tpu.core_type<tc>, window_params = [{transform_indices = @transform_0, window_bounds = array<i64: 8, 32>}, {pipeline_mode = #tpu.pipeline_mode<synchronous>, transform_indices = @transform_1, window_bounds = array<i64: 32, 16>}, {pipeline_mode = #tpu.pipeline_mode<synchronous>, transform_indices = @transform_2, window_bounds = array<i64: 1, 16>}, {transform_indices = @transform_3, window_bounds = array<i64: 8, 16>}]} {
    %c0 = arith.constant 0 : index
    %c0_0 = arith.constant 0 : index
    %0 = vector.load %arg1[%c0, %c0_0] : memref<8x32xf32, #tpu.memory_space<vmem>>, vector<8x32xf32>
    %c0_1 = arith.constant 0 : index
    %c0_2 = arith.constant 0 : index
    %1 = vector.load %arg2[%c0_1, %c0_2] : memref<32x16xf32, #tpu.memory_space<vmem>>, vector<32x16xf32>
    %cst = arith.constant dense<0.000000e+00> : vector<8x16xf32>
    %2 = tpu.matmul %0, %1, %cst {dimension_numbers = #tpu.dot_dimension_numbers<[1], [0], [0], [1], [0, 0, 1, 1], [], []>} : vector<8x32xf32>, vector<32x16xf32>, vector<8x16xf32> -> vector<8x16xf32>
    %c0_3 = arith.constant 0 : index
    %c0_4 = arith.constant 0 : index
    %3 = vector.load %arg3[%c0_3, %c0_4] : memref<1x16xf32, #tpu.memory_space<vmem>>, vector<1x16xf32>
    %4 = vector.broadcast %3 : vector<1x16xf32> to vector<8x16xf32>
    %5 = arith.addf %2, %4 : vector<8x16xf32>
    %c0_5 = arith.constant 0 : index
    %c0_6 = arith.constant 0 : index
    %6 = vector.load %arg4[%c0_5, %c0_6] : memref<8x16xf32, #tpu.memory_space<vmem>>, vector<8x16xf32>
    tpu.vector_store %arg4[%c0_5, %c0_6], %5 {strides = array<i32>} : memref<8x16xf32, #tpu.memory_space<vmem>>, vector<8x16xf32>,
    return
  }
  func.func @transform_0(%arg0: i32) -> (i32, i32) {
    %c0_i32 = arith.constant 0 : i32
    %c0_i32_0 = arith.constant 0 : i32
    return %arg0, %c0_i32 : i32, i32
  }
  func.func @transform_1(%arg0: i32) -> (i32, i32) {
    %c0_i32 = arith.constant 0 : i32
    %c0_i32_0 = arith.constant 0 : i32
    %c0_i32_1 = arith.constant 0 : i32
    return %c0_i32, %c0_i32_0 : i32, i32
  }
  func.func @transform_2(%arg0: i32) -> (i32, i32) {
    %c0_i32 = arith.constant 0 : i32
    %c0_i32_0 = arith.constant 0 : i32
    %c0_i32_1 = arith.constant 0 : i32
    return %c0_i32, %c0_i32_0 : i32, i32
  }
  func.func @transform_3(%arg0: i32) -> (i32, i32) {
    %c0_i32 = arith.constant 0 : i32
    %c0_i32_0 = arith.constant 0 : i32
    return %arg0, %c0_i32 : i32, i32
  }
}

</mosaic_0001>

<bundles_post_ra>
// kernel: tpu_custom_call.1
= control target key start
LH: loop header
LB: loop body
LE: loop exit
PB: predicated region body
PF: predicated region fallthrough
CT: control target
= control target key end

     0   :  { %s374_s12 = smov 0   ;;  %s406_s0 = inlined_call_operand.vmem [shape: f32[20,32], index: 0, kind: input, shape index: {}]   ;;  %s407_s1 = inlined_call_operand.vmem [shape: f32[32,16], index: 1, kind: input, shape index: {}]   ;;  %s408_s2 = inlined_call_operand.vmem [shape: f32[1,16], index: 2, kind: input, shape index: {}]   ;;  %s409_s3 = inlined_call_operand.vmem [shape: f32[20,16], index: 3, kind: output, shape index: {}]  }
   0x1 LB: > { %s307_s13 = sadd.s32 4294967295, %s350_s12   ;;  %p311_p0 = scmp.ge.s32.totalorder %s350_s12, 1  ;;  %s350_s12 = sphi %s374_s12, %s13_s12  }
   0x2   : > { %p136_p1 = scmp.lt.s32.totalorder %s350_s12, 4 }
   0x4   : > { %p137_p2 = pnand %p311_p0, %p136_p1 }
   0x5   : > { %p158_p3 = scmp.lt.s32.totalorder (!%p137_p2), %s307_s13, 2 }
   0x6   : > { %140 = sbr.rel (%p137_p2) target bundleno = 216 (0xd8), region = 32 }
   0xb   : > { %v170_v0 = vld [vmem:[%s407_s1 + $0x18] sm:$0xff]  ;;  %v352_v1 = vmov 0.0   ;;  %v169_v2 = vld [vmem:[%s407_s1 + $0x10] sm:$0xff]  ;;  %vm353_vm0 = vmmov 0   ;;  %s411_s13 = smov (!%p158_p3, %s307_s13), 2  ;;  %v168_v3 = vld [vmem:[%s407_s1 + $0x8] sm:$0xff] }
   0xc   : > { %323 = vmatprep.subr.mxu0 %v352_v1  ;;  %331 = vmatprep.mubr.msk.f32.mxu0 %vm353_vm0, %v352_v1  ;;  %s312_s20 = sshll.u32 %s411_s13, 3  ;;  %v167_v4 = vld [vmem:[%s407_s1] sm:$0xff]  ;;  %vm178_vm1 = vcmask 261120   ;;  %vm252_vm2 = vcmask 130048  }
   0xd   : > { %324 = vmatpush3.msra.mxu0 %v170_v0  ;;  %s161_s25 = scalar_lea.vmem %s406_s0, %s312_s20  ;;  %v314_v6 = vld [vmem:[%s408_s2] ss:$0 sm:$0xff]  ;;  %s165_s30 = scalar_lea.vmem %s409_s3, %s312_s20 }
   0xe   : > { %325 = vmatprep.subr.mxu0 %v352_v1  ;;  %v166_v5 = vld [vmem:[%s161_s25] sm:$0xff] }
   0xf   : > { %326 = vmatpush3.msra.mxu0 %v169_v2 }
  0x10   : > { %327 = vmatprep.subr.mxu0 %v352_v1 }
  0x11   : > { %328 = vmatpush3.msra.mxu0 %v168_v3 }
  0x12   : > { %329 = vmatprep.subr.mxu0 %v352_v1 }
  0x13   : > { %330 = vmatpush3.msra.mxu0 %v167_v4 }
  0x14   : > { %332 = vmatmul.mubr.msk.f32.vlgmr.msra.gmra.mxu0 %vm178_vm1, %v166_v5 }
  0xd4   : > { %v248_v7 = vpop.f32.mrf.mxu0 }
  0xd5   : > { %v249_v8 = vadd.f32 %v314_v6, %v248_v7 }
  0xd6   : > { %v333_v9 = vpop.f32.mrf.mxu0 }
  0xd7   : > { %253 = vst.msk [vmem:[%s165_s30] sm:$0xff] %vm252_vm2, %v249_v8 }
  0xd8 PF: > { %s13_s12 = sadd.s32 1, %s350_s12  }
  0xd9   : > { %p10_p4 = scmp.ge.s32.totalorder %s13_s12, 5  }
  0xdb   :  { %12 = sbr.rel (!%p10_p4) target bundleno = 1 (0x1), region = 62 }

</bundles_post_ra>
